<compile_context>
chip_gen: v6e
topology: v6e:2x2x1
jax: 0.10.0
libtpu: 0.0.40
codegen_flags: <defaults>
</compile_context>

<pallas_src>
import jax
import jax.numpy as jnp
from jax.experimental import pallas as pl
from jax.experimental.pallas import tpu as pltpu


_ALIGN = 8  # sublane alignment for the interior-row store into the padded scratch


def _conv_layer_kernel(x_ref, w1_ref, b1_ref, w2_ref, b2_ref, o_ref,
                       pad1_ref, pad2_ref):
    """Fused (conv3x3 + BN + ReLU) x 2 for one batch element.

    x_ref:    (1, H, W*Cin)           input, channels-last flattened into lanes
    w1_ref:   (3, W*Cin,  W*Cout)     banded weights (BN scale folded in)
    b1_ref:   (1, W*Cout)             folded bias, tiled over W
    w2_ref:   (3, W*Cout, W*Cout)
    b2_ref:   (1, W*Cout)
    o_ref:    (1, H, W*Cout)
    pad1_ref: (ALIGN+H+1, W*Cin)      scratch: rows ALIGN-1 .. ALIGN+H hold the
                                      H-padded image (halo rows stay zero)
    pad2_ref: (ALIGN+H+1, W*Cout)     same for the stage-2 input
    """
    H = o_ref.shape[1]

    def conv_rows(pad_ref, w_ref, b_ref):
        # 3 matmuls (one per kernel row); W-taps + Cin are folded into K.
        acc = jnp.zeros((H, w_ref.shape[-1]), jnp.float32)
        for dy in range(3):
            row0 = _ALIGN - 1 + dy
            acc = acc + jnp.dot(
                pad_ref[row0:row0 + H, :],
                w_ref[dy],
                preferred_element_type=jnp.float32,
            )
        # folded BN bias + ReLU (f32 epilogue, lane-dense)
        return jnp.maximum(acc + b_ref[...], 0.0)

    # ---- stage 1 ---------------------------------------------------------
    pad1_ref[...] = jnp.zeros_like(pad1_ref)                  # zero halo rows
    pad1_ref[_ALIGN:_ALIGN + H, :] = x_ref[0].astype(jnp.float32)
    y1 = conv_rows(pad1_ref, w1_ref, b1_ref)                  # (H, W*Cout)

    # ---- stage 2 (intermediate never leaves VMEM) ------------------------
    pad2_ref[...] = jnp.zeros_like(pad2_ref)
    pad2_ref[_ALIGN:_ALIGN + H, :] = y1
    y2 = conv_rows(pad2_ref, w2_ref, b2_ref)                  # (H, W*Cout)

    o_ref[0] = y2.astype(o_ref.dtype)


def _make_banded_weights(w_hwio, W):
    """(3,3,Cin,Cout) -> (3, W*Cin, W*Cout) banded matrices.

    band[dy][(wi+dx-1)*Cin + ci, wi*Cout + co] = w[dy, dx, ci, co]; taps that
    fall outside [0, W) are dropped, which implements the zero padding in the
    W direction.  Folds the three W-taps and all Cin into the contraction dim.
    """
    kh, kw, cin, cout = w_hwio.shape
    bands = []
    for dy in range(kh):
        b = jnp.zeros((W * cin, W * cout), w_hwio.dtype)
        for dx in range(kw):
            # S[p, wi] = 1 iff p == wi + dx - 1  (shifted identity)
            shift = jnp.eye(W, k=1 - dx, dtype=w_hwio.dtype)
            b = b + jnp.kron(shift, w_hwio[dy, dx])
        bands.append(b)
    return jnp.stack(bands, axis=0)


def _fold_bn(conv_bias, gamma, beta, running_mean, running_var, eps=1e-5):
    s = gamma / jnp.sqrt(running_var + eps)
    b = s * (conv_bias - running_mean) + beta
    return s, b


def conv_layer_forward(x_nchw, p):
    """Equivalent of ConvLayer.forward (eval-mode BN). Input/output NCHW."""
    N, Cin, H, W = x_nchw.shape
    Cout = p["w1"].shape[-1]

    s1, b1 = _fold_bn(p["b1"], p["gamma1"], p["beta1"], p["mean1"], p["var1"])
    s2, b2 = _fold_bn(p["b2"], p["gamma2"], p["beta2"], p["mean2"], p["var2"])

    # Fold BN scale into the conv weights (trace-time, free) and build the
    # banded weight matrices that carry the W-direction taps in K.
    w1_banded = _make_banded_weights(p["w1"] * s1[None, None, None, :], W)
    w2_banded = _make_banded_weights(p["w2"] * s2[None, None, None, :], W)
    b1_row = jnp.tile(b1, W)[None, :].astype(jnp.float32)    # (1, W*Cout)
    b2_row = jnp.tile(b2, W)[None, :].astype(jnp.float32)

    # NCHW -> NHWC -> (N, H, W*C): channels-last, flattened into the lane axis.
    x2d = jnp.transpose(x_nchw, (0, 2, 3, 1)).reshape(N, H, W * Cin)

    out2d = pl.pallas_call(
        _conv_layer_kernel,
        out_shape=jax.ShapeDtypeStruct((N, H, W * Cout), x_nchw.dtype),
        grid=(N,),
        in_specs=[
            pl.BlockSpec((1, H, W * Cin), lambda n: (n, 0, 0)),
            pl.BlockSpec((3, W * Cin, W * Cout), lambda n: (0, 0, 0)),
            pl.BlockSpec((1, W * Cout), lambda n: (0, 0)),
            pl.BlockSpec((3, W * Cout, W * Cout), lambda n: (0, 0, 0)),
            pl.BlockSpec((1, W * Cout), lambda n: (0, 0)),
        ],
        out_specs=pl.BlockSpec((1, H, W * Cout), lambda n: (n, 0, 0)),
        scratch_shapes=[
            pltpu.VMEM((_ALIGN + H + 1, W * Cin), jnp.float32),
            pltpu.VMEM((_ALIGN + H + 1, W * Cout), jnp.float32),
        ],
        compiler_params=pltpu.CompilerParams(
            dimension_semantics=("parallel",),
        ),
    )(x2d, w1_banded, b1_row, w2_banded, b2_row)

    out = out2d.reshape(N, H, W, Cout)
    return jnp.transpose(out, (0, 3, 1, 2))                  # NHWC -> NCHW


def init_params(key, in_ch, out_ch):
    ks = jax.random.split(key, 8)
    p = {
        # conv weights stored HWIO
        "w1": 0.1 * jax.random.normal(ks[0], (3, 3, in_ch, out_ch), jnp.float32),
        "b1": 0.1 * jax.random.normal(ks[1], (out_ch,), jnp.float32),
        "w2": 0.1 * jax.random.normal(ks[2], (3, 3, out_ch, out_ch), jnp.float32),
        "b2": 0.1 * jax.random.normal(ks[3], (out_ch,), jnp.float32),
        # BatchNorm params (deterministic, non-trivial)
        "gamma1": 1.0 + 0.1 * jax.random.normal(ks[4], (out_ch,), jnp.float32),
        "beta1": 0.1 * jax.random.normal(ks[5], (out_ch,), jnp.float32),
        "mean1": jnp.zeros((out_ch,), jnp.float32),
        "var1": jnp.ones((out_ch,), jnp.float32),
        "gamma2": 1.0 + 0.1 * jax.random.normal(ks[6], (out_ch,), jnp.float32),
        "beta2": 0.1 * jax.random.normal(ks[7], (out_ch,), jnp.float32),
        "mean2": jnp.zeros((out_ch,), jnp.float32),
        "var2": jnp.ones((out_ch,), jnp.float32),
    }
    return p


def _reference_forward(x_nchw, p):
    """Pure-JAX reference using lax.conv_general_dilated (sanity check)."""
    def conv_bn_relu(x, w_hwio, cb, g, bt, m, v):
        w_oihw = jnp.transpose(w_hwio, (3, 2, 0, 1))
        y = jax.lax.conv_general_dilated(
            x, w_oihw, window_strides=(1, 1), padding=((1, 1), (1, 1)),
            dimension_numbers=("NCHW", "OIHW", "NCHW"),
        ) + cb[None, :, None, None]
        s = g / jnp.sqrt(v + 1e-5)
        y = s[None, :, None, None] * (y - m[None, :, None, None]) \
            + bt[None, :, None, None]
        return jnp.maximum(y, 0.0)

    x = conv_bn_relu(x_nchw, p["w1"], p["b1"], p["gamma1"], p["beta1"],
                     p["mean1"], p["var1"])
    x = conv_bn_relu(x, p["w2"], p["b2"], p["gamma2"], p["beta2"],
                     p["mean2"], p["var2"])
    return x


if __name__ == "__main__":
    key = jax.random.PRNGKey(0)
    k_x, k_p = jax.random.split(key)

    N, IN_CH, OUT_CH, H, W = 2, 4, 8, 16, 16
    x = jax.random.normal(k_x, (N, IN_CH, H, W), jnp.float32)   # NCHW like PyTorch
    params = init_params(k_p, IN_CH, OUT_CH)

    out = conv_layer_forward(x, params)
    out = jax.block_until_ready(out)

    ref = _reference_forward(x, params)
    assert out.shape == (N, OUT_CH, H, W)
    assert jnp.allclose(out, ref, atol=1e-3, rtol=1e-3), "mismatch vs reference"

    print("KERNEL_OK")
</pallas_src>

<mosaic_0001>
module attributes {stable_mosaic.version = 11 : i64} {
  func.func @_conv_layer_kernel(%arg0: i32, %arg1: memref<1x16x64xf32, #tpu.memory_space<vmem>>, %arg2: memref<3x64x128xf32, #tpu.memory_space<vmem>>, %arg3: memref<1x128xf32, #tpu.memory_space<vmem>>, %arg4: memref<3x128x128xf32, #tpu.memory_space<vmem>>, %arg5: memref<1x128xf32, #tpu.memory_space<vmem>>, %arg6: memref<1x16x128xf32, #tpu.memory_space<vmem>>, %arg7: memref<25x64xf32, #tpu.memory_space<vmem>>, %arg8: memref<25x128xf32, #tpu.memory_space<vmem>>) attributes {dimension_semantics = [#tpu.dimension_semantics<parallel>], iteration_bounds = array<i64: 2>, scalar_prefetch = 0 : i64, scratch_operands = 2 : i64, tpu.core_type = #tpu.core_type<tc>, window_params = [{transform_indices = @transform_0, window_bounds = array<i64: 1, 16, 64>}, {pipeline_mode = #tpu.pipeline_mode<synchronous>, transform_indices = @transform_1, window_bounds = array<i64: 3, 64, 128>}, {pipeline_mode = #tpu.pipeline_mode<synchronous>, transform_indices = @transform_2, window_bounds = array<i64: 1, 128>}, {pipeline_mode = #tpu.pipeline_mode<synchronous>, transform_indices = @transform_3, window_bounds = array<i64: 3, 128, 128>}, {pipeline_mode = #tpu.pipeline_mode<synchronous>, transform_indices = @transform_4, window_bounds = array<i64: 1, 128>}, {transform_indices = @transform_5, window_bounds = array<i64: 1, 16, 128>}]} {
    %cst = arith.constant 0.000000e+00 : f32
    %0 = vector.broadcast %cst : f32 to vector<25x64xf32>
    %c0 = arith.constant 0 : index
    %c0_0 = arith.constant 0 : index
    %1 = vector.load %arg7[%c0, %c0_0] : memref<25x64xf32, #tpu.memory_space<vmem>>, vector<25x64xf32>
    tpu.vector_store %arg7[%c0, %c0_0], %0 {strides = array<i32>} : memref<25x64xf32, #tpu.memory_space<vmem>>, vector<25x64xf32>,
    %c0_1 = arith.constant 0 : index
    %c0_2 = arith.constant 0 : index
    %c0_3 = arith.constant 0 : index
    %2 = vector.load %arg1[%c0_1, %c0_2, %c0_3] : memref<1x16x64xf32, #tpu.memory_space<vmem>>, vector<1x16x64xf32>
    %3 = vector.shape_cast %2 : vector<1x16x64xf32> to vector<16x64xf32>
    %c8 = arith.constant 8 : index
    %c0_4 = arith.constant 0 : index
    %4 = vector.load %arg7[%c8, %c0_4] : memref<25x64xf32, #tpu.memory_space<vmem>>, vector<16x64xf32>
    tpu.vector_store %arg7[%c8, %c0_4], %3 {strides = array<i32>} : memref<25x64xf32, #tpu.memory_space<vmem>>, vector<16x64xf32>,
    %cst_5 = arith.constant 0.000000e+00 : f32
    %5 = vector.broadcast %cst_5 : f32 to vector<16x128xf32>
    %c7 = arith.constant 7 : index
    %c0_6 = arith.constant 0 : index
    %6 = vector.load %arg7[%c7, %c0_6] : memref<25x64xf32, #tpu.memory_space<vmem>>, vector<16x64xf32>
    %c0_7 = arith.constant 0 : index
    %c0_8 = arith.constant 0 : index
    %c0_9 = arith.constant 0 : index
    %7 = vector.load %arg2[%c0_7, %c0_8, %c0_9] : memref<3x64x128xf32, #tpu.memory_space<vmem>>, vector<1x64x128xf32>
    %8 = vector.shape_cast %7 : vector<1x64x128xf32> to vector<64x128xf32>
    %cst_10 = arith.constant dense<0.000000e+00> : vector<16x128xf32>
    %9 = tpu.matmul %6, %8, %cst_10 {dimension_numbers = #tpu.dot_dimension_numbers<[1], [0], [0], [1], [0, 0, 1, 1], [], []>} : vector<16x64xf32>, vector<64x128xf32>, vector<16x128xf32> -> vector<16x128xf32>
    %10 = arith.addf %5, %9 : vector<16x128xf32>
    %c8_11 = arith.constant 8 : index
    %c0_12 = arith.constant 0 : index
    %11 = vector.load %arg7[%c8_11, %c0_12] : memref<25x64xf32, #tpu.memory_space<vmem>>, vector<16x64xf32>
    %c1 = arith.constant 1 : index
    %c0_13 = arith.constant 0 : index
    %c0_14 = arith.constant 0 : index
    %12 = vector.load %arg2[%c1, %c0_13, %c0_14] : memref<3x64x128xf32, #tpu.memory_space<vmem>>, vector<1x64x128xf32>
    %13 = vector.shape_cast %12 : vector<1x64x128xf32> to vector<64x128xf32>
    %cst_15 = arith.constant dense<0.000000e+00> : vector<16x128xf32>
    %14 = tpu.matmul %11, %13, %cst_15 {dimension_numbers = #tpu.dot_dimension_numbers<[1], [0], [0], [1], [0, 0, 1, 1], [], []>} : vector<16x64xf32>, vector<64x128xf32>, vector<16x128xf32> -> vector<16x128xf32>
    %15 = arith.addf %10, %14 : vector<16x128xf32>
    %c9 = arith.constant 9 : index
    %c0_16 = arith.constant 0 : index
    %16 = vector.load %arg7[%c9, %c0_16] : memref<25x64xf32, #tpu.memory_space<vmem>>, vector<16x64xf32>
    %c2 = arith.constant 2 : index
    %c0_17 = arith.constant 0 : index
    %c0_18 = arith.constant 0 : index
    %17 = vector.load %arg2[%c2, %c0_17, %c0_18] : memref<3x64x128xf32, #tpu.memory_space<vmem>>, vector<1x64x128xf32>
    %18 = vector.shape_cast %17 : vector<1x64x128xf32> to vector<64x128xf32>
    %cst_19 = arith.constant dense<0.000000e+00> : vector<16x128xf32>
    %19 = tpu.matmul %16, %18, %cst_19 {dimension_numbers = #tpu.dot_dimension_numbers<[1], [0], [0], [1], [0, 0, 1, 1], [], []>} : vector<16x64xf32>, vector<64x128xf32>, vector<16x128xf32> -> vector<16x128xf32>
    %20 = arith.addf %15, %19 : vector<16x128xf32>
    %c0_20 = arith.constant 0 : index
    %c0_21 = arith.constant 0 : index
    %21 = vector.load %arg3[%c0_20, %c0_21] : memref<1x128xf32, #tpu.memory_space<vmem>>, vector<1x128xf32>
    %22 = vector.broadcast %21 : vector<1x128xf32> to vector<16x128xf32>
    %23 = arith.addf %20, %22 : vector<16x128xf32>
    %cst_22 = arith.constant 0.000000e+00 : f32
    %24 = vector.broadcast %cst_22 : f32 to vector<16x128xf32>
    %25 = arith.maximumf %23, %24 : vector<16x128xf32>
    %cst_23 = arith.constant 0.000000e+00 : f32
    %26 = vector.broadcast %cst_23 : f32 to vector<25x128xf32>
    %c0_24 = arith.constant 0 : index
    %c0_25 = arith.constant 0 : index
    %27 = vector.load %arg8[%c0_24, %c0_25] : memref<25x128xf32, #tpu.memory_space<vmem>>, vector<25x128xf32>
    tpu.vector_store %arg8[%c0_24, %c0_25], %26 {strides = array<i32>} : memref<25x128xf32, #tpu.memory_space<vmem>>, vector<25x128xf32>,
    %c8_26 = arith.constant 8 : index
    %c0_27 = arith.constant 0 : index
    %28 = vector.load %arg8[%c8_26, %c0_27] : memref<25x128xf32, #tpu.memory_space<vmem>>, vector<16x128xf32>
    tpu.vector_store %arg8[%c8_26, %c0_27], %25 {strides = array<i32>} : memref<25x128xf32, #tpu.memory_space<vmem>>, vector<16x128xf32>,
    %cst_28 = arith.constant 0.000000e+00 : f32
    %29 = vector.broadcast %cst_28 : f32 to vector<16x128xf32>
    %c7_29 = arith.constant 7 : index
    %c0_30 = arith.constant 0 : index
    %30 = vector.load %arg8[%c7_29, %c0_30] : memref<25x128xf32, #tpu.memory_space<vmem>>, vector<16x128xf32>
    %c0_31 = arith.constant 0 : index
    %c0_32 = arith.constant 0 : index
    %c0_33 = arith.constant 0 : index
    %31 = vector.load %arg4[%c0_31, %c0_32, %c0_33] : memref<3x128x128xf32, #tpu.memory_space<vmem>>, vector<1x128x128xf32>
    %32 = vector.shape_cast %31 : vector<1x128x128xf32> to vector<128x128xf32>
    %cst_34 = arith.constant dense<0.000000e+00> : vector<16x128xf32>
    %33 = tpu.matmul %30, %32, %cst_34 {dimension_numbers = #tpu.dot_dimension_numbers<[1], [0], [0], [1], [0, 0, 1, 1], [], []>} : vector<16x128xf32>, vector<128x128xf32>, vector<16x128xf32> -> vector<16x128xf32>
    %34 = arith.addf %29, %33 : vector<16x128xf32>
    %c8_35 = arith.constant 8 : index
    %c0_36 = arith.constant 0 : index
    %35 = vector.load %arg8[%c8_35, %c0_36] : memref<25x128xf32, #tpu.memory_space<vmem>>, vector<16x128xf32>
    %c1_37 = arith.constant 1 : index
    %c0_38 = arith.constant 0 : index
    %c0_39 = arith.constant 0 : index
    %36 = vector.load %arg4[%c1_37, %c0_38, %c0_39] : memref<3x128x128xf32, #tpu.memory_space<vmem>>, vector<1x128x128xf32>
    %37 = vector.shape_cast %36 : vector<1x128x128xf32> to vector<128x128xf32>
    %cst_40 = arith.constant dense<0.000000e+00> : vector<16x128xf32>
    %38 = tpu.matmul %35, %37, %cst_40 {dimension_numbers = #tpu.dot_dimension_numbers<[1], [0], [0], [1], [0, 0, 1, 1], [], []>} : vector<16x128xf32>, vector<128x128xf32>, vector<16x128xf32> -> vector<16x128xf32>
    %39 = arith.addf %34, %38 : vector<16x128xf32>
    %c9_41 = arith.constant 9 : index
    %c0_42 = arith.constant 0 : index
    %40 = vector.load %arg8[%c9_41, %c0_42] : memref<25x128xf32, #tpu.memory_space<vmem>>, vector<16x128xf32>
    %c2_43 = arith.constant 2 : index
    %c0_44 = arith.constant 0 : index
    %c0_45 = arith.constant 0 : index
    %41 = vector.load %arg4[%c2_43, %c0_44, %c0_45] : memref<3x128x128xf32, #tpu.memory_space<vmem>>, vector<1x128x128xf32>
    %42 = vector.shape_cast %41 : vector<1x128x128xf32> to vector<128x128xf32>
    %cst_46 = arith.constant dense<0.000000e+00> : vector<16x128xf32>
    %43 = tpu.matmul %40, %42, %cst_46 {dimension_numbers = #tpu.dot_dimension_numbers<[1], [0], [0], [1], [0, 0, 1, 1], [], []>} : vector<16x128xf32>, vector<128x128xf32>, vector<16x128xf32> -> vector<16x128xf32>
    %44 = arith.addf %39, %43 : vector<16x128xf32>
    %c0_47 = arith.constant 0 : index
    %c0_48 = arith.constant 0 : index
    %45 = vector.load %arg5[%c0_47, %c0_48] : memref<1x128xf32, #tpu.memory_space<vmem>>, vector<1x128xf32>
    %46 = vector.broadcast %45 : vector<1x128xf32> to vector<16x128xf32>
    %47 = arith.addf %44, %46 : vector<16x128xf32>
    %cst_49 = arith.constant 0.000000e+00 : f32
    %48 = vector.broadcast %cst_49 : f32 to vector<16x128xf32>
    %49 = arith.maximumf %47, %48 : vector<16x128xf32>
    %c0_50 = arith.constant 0 : index
    %c0_51 = arith.constant 0 : index
    %c0_52 = arith.constant 0 : index
    %50 = vector.load %arg6[%c0_50, %c0_51, %c0_52] : memref<1x16x128xf32, #tpu.memory_space<vmem>>, vector<1x16x128xf32>
    %51 = vector.shape_cast %50 : vector<1x16x128xf32> to vector<16x128xf32>
    %52 = vector.shape_cast %49 : vector<16x128xf32> to vector<1x16x128xf32>
    tpu.vector_store %arg6[%c0_50, %c0_51, %c0_52], %52 {strides = array<i32>} : memref<1x16x128xf32, #tpu.memory_space<vmem>>, vector<1x16x128xf32>,
    return
  }
  func.func @transform_0(%arg0: i32) -> (i32, i32, i32) {
    %c0_i32 = arith.constant 0 : i32
    %c0_i32_0 = arith.constant 0 : i32
    %c0_i32_1 = arith.constant 0 : i32
    return %arg0, %c0_i32, %c0_i32_0 : i32, i32, i32
  }
  func.func @transform_1(%arg0: i32) -> (i32, i32, i32) {
    %c0_i32 = arith.constant 0 : i32
    %c0_i32_0 = arith.constant 0 : i32
    %c0_i32_1 = arith.constant 0 : i32
    %c0_i32_2 = arith.constant 0 : i32
    return %c0_i32, %c0_i32_0, %c0_i32_1 : i32, i32, i32
  }
  func.func @transform_2(%arg0: i32) -> (i32, i32) {
    %c0_i32 = arith.constant 0 : i32
    %c0_i32_0 = arith.constant 0 : i32
    %c0_i32_1 = arith.constant 0 : i32
    return %c0_i32, %c0_i32_0 : i32, i32
  }
  func.func @transform_3(%arg0: i32) -> (i32, i32, i32) {
    %c0_i32 = arith.constant 0 : i32
    %c0_i32_0 = arith.constant 0 : i32
    %c0_i32_1 = arith.constant 0 : i32
    %c0_i32_2 = arith.constant 0 : i32
    return %c0_i32, %c0_i32_0, %c0_i32_1 : i32, i32, i32
  }
  func.func @transform_4(%arg0: i32) -> (i32, i32) {
    %c0_i32 = arith.constant 0 : i32
    %c0_i32_0 = arith.constant 0 : i32
    %c0_i32_1 = arith.constant 0 : i32
    return %c0_i32, %c0_i32_0 : i32, i32
  }
  func.func @transform_5(%arg0: i32) -> (i32, i32, i32) {
    %c0_i32 = arith.constant 0 : i32
    %c0_i32_0 = arith.constant 0 : i32
    %c0_i32_1 = arith.constant 0 : i32
    return %arg0, %c0_i32, %c0_i32_0 : i32, i32, i32
  }
}

</mosaic_0001>

<bundles_post_ra>
// kernel: tpu_custom_call.1
= control target key start
LH: loop header
LB: loop body
LE: loop exit
PB: predicated region body
PF: predicated region fallthrough
CT: control target
= control target key end

     0   :  { %10 = vsyncpa [#allocation5], 0  ;;  %s1735_s0 = inlined_call_operand.hbm [shape: f32[2,16,64], index: 0, kind: input, shape index: {}]   ;;  %s1736_s1 = inlined_call_operand.hbm [shape: f32[3,64,128], index: 1, kind: input, shape index: {}]   ;;  %s1737_s2 = inlined_call_operand.vmem [shape: f32[1,128], index: 2, kind: input, shape index: {}]   ;;  %s1738_s3 = inlined_call_operand.hbm [shape: f32[3,128,128], index: 3, kind: input, shape index: {}]   ;;  %s1739_s4 = inlined_call_operand.vmem [shape: f32[1,128], index: 4, kind: input, shape index: {}]   ;;  %s1740_s5 = inlined_call_operand.hbm [shape: f32[2,16,128], index: 5, kind: output, shape index: {}]  }
   0x1   :  { %12 = vsyncpa [#allocation5 + $0x1], 0 }
   0x2   :  { %13 = vsyncpa [#allocation8], 0 }
   0x3   :  { %14 = vsyncpa [#allocation6], 0 }
   0x4   :  { %16 = vsyncpa [#allocation6 + $0x1], 0  ;;  %s1513_s18 = smov 0   ;;  %s1515_s19 = smov 0  }
   0x5   :  { %s1517_s20 = smov 0   ;;  %s1519_s21 = smov 0  }
   0x6 LB: > { %s1534_s22 = sadd.s32 4294967295, %s1472_s21   ;;  %s978_s23 = sadd.s32 4294967294, %s1472_s21   ;;  %s1472_s21 = sphi %s1519_s21, %s1763_s21   ;;  %s1468_s20 = sphi %s1517_s20, %s1762_s20   ;;  %s1464_s19 = sphi %s1515_s19, %s1761_s19   ;;  %s1460_s18 = sphi %s1513_s18, %s1760_s18  }
   0x7   : > { %p42_p0 = scmp.ne.s32.totalorder %s1464_s19, %s1460_s18  ;;  %p1741_p1 = scmp.eq.s32.totalorder %s1534_s22, 0 }
   0x8   : > { %p150_p2 = scmp.eq.s32.totalorder %s1534_s22, 1  ;;  %p156_p3 = scmp.eq.s32.totalorder %s978_s23, 1 }
   0x9   : > { %p1543_p4 = por %p1741_p1, %p42_p0  ;;  %p979_p5 = scmp.ge.s32.totalorder %s1472_s21, 1 }
   0xa   : > { %p1548_p6 = por %p156_p3, %p42_p0  ;;  %p163_p7 = scmp.lt.s32.totalorder %s1472_s21, 3 }
   0xb   : > { %s1746_s24 = scalar_select %p1543_p4, 1, 0 }
   0xc   : > { %s1747_s25 = scalar_select %p1548_p6, 1, 0 }
   0xd   : > { %p1553_p8 = pnand %p979_p5, %p163_p7  ;;  %s1474_s27 = smov [#allocation7]  }
   0xe   : > { %s175_s28 = sshll.u32 %s1474_s27, 4  ;;  %s1475_s30 = smov [#allocation9]   ;;  %s176_s28 = int_to_ptr.vmem [resolvable:$true] %s175_s28 }
   0xf   : > { %s1748_s26 = scalar_select %p1553_p8, 1, 0 }
  0x10   : > { %p1264_p9 = pneg %p1553_p8  ;;  %s191_s6 = sshll.u32 %s1475_s30, 4  ;;  %s192_s6 = int_to_ptr.vmem [resolvable:$true] %s191_s6 }
  0x11   : > { %s1335_s7 = scalar_lea.vmem %s176_s28, 3072  ;;  %p1343_p5 = scmp.lt.s32.totalorder %s176_s28, %s176_s28 }
  0x12   : > { %p1562_p11 = pnand %p1264_p9, %p1741_p1  ;;  %p1336_p13 = scmp.ne.s32.totalorder %s176_s28, %s1335_s7 }
  0x13   : > { %p1344_p7 = scmp.lt.s32.totalorder %s1335_s7, %s1335_s7 }
  0x14   : > { %p1326_p12 = pneg %p1562_p11 }
  0x15   : > { %p1345_p10 = por %p1344_p7, %p1343_p5 }
  0x16   : > { %p1338_p0 = pnand %p1336_p13, %p1326_p12 }
  0x18   : > { %p1339_p3 = pneg %p1338_p0 }
  0x1a   : > { %p1346_p9 = pnand %p1345_p10, %p1339_p3 }
  0x1c   : > { %1349 = shalt.err (!%p1346_p9)
}
  0x1d   : > { %s1742_s8 = smov 128   ;;  %s1477_s9 = smov 8  }
  0x1e   : > { %1267 = dma.hbm_to_vmem [thread:$0]  (!%p1562_p11), %s1736_s1, 3072, %s176_s28, [#allocation8], %s1742_s8, %s1742_s8, %s1477_s9  }
  0x1f   : > { %s1361_s12 = scalar_lea.vmem %s192_s6, 6144  ;;  %p1369_p10 = scmp.lt.s32.totalorder %s192_s6, %s192_s6 }
  0x20   : > { %p1362_p13 = scmp.ne.s32.totalorder %s192_s6, %s1361_s12  ;;  %p1370_p3 = scmp.lt.s32.totalorder %s1361_s12, %s1361_s12 }
  0x22   : > { %p1364_p0 = pnand %p1362_p13, %p1326_p12  ;;  %p1371_p7 = por %p1370_p3, %p1369_p10 }
  0x24   : > { %p1365_p5 = pneg %p1364_p0 }
  0x26   : > { %p1372_p9 = pnand %p1371_p7, %p1365_p5 }
  0x28   : > { %1375 = shalt.err (!%p1372_p9)
}
  0x29   : > { %1270 = dma.hbm_to_vmem [thread:$0]  (!%p1562_p11), %s1738_s3, 6144, %s192_s6, [#allocation8], %s1742_s8, %s1742_s8, %s1477_s9  }
  0x2a   : > { %s1591_s15 = sadd.s32 1, %s1472_s21   ;;  %s29_s16 = sadd.s32 1, %s1468_s20 }
  0x2b   : > { %s26_s17 = ssub.s32 %s1472_s21, %s1591_s15  ;;  %p36_p12 = scmp.ne.s32.totalorder %s1468_s20, %s1464_s19 }
  0x2c   : > { %p27_p13 = scmp.eq.s32.totalorder %s26_s17, 0  ;;  %p37_p0 = scmp.eq.s32.totalorder %s1472_s21, 0 }
  0x2d   : > { %p1601_p5 = por %p150_p2, %p36_p12  ;;  %p1281_p10 = scmp.lt.s32.totalorder %s1472_s21, 2 }
  0x2e   : > { %s1607_s27 = scalar_select %p27_p13, %s1468_s20, %s29_s16  }
  0x2f   : > { %s1750_s23 = scalar_select %p1601_p5, 1, 0 }
  0x30   : > { %p38_p3 = por %p37_p0, %p36_p12  ;;  %s208_s28 = sand.u32 1, %s1468_s20  }
  0x31   : > { %s983_s29 = sshll.u32 %s208_s28, 4  ;;  %s1004_s30 = sshll.u32 %s1472_s21, 8 }
  0x32   : > { %s1614_s10 = scalar_lea.hbm %s1735_s0, %s1004_s30  ;;  %s212_s11 = scalar_lea.vmem [#allocation4], %s983_s29 }
  0x33   : > { %s219_s12 = sshll.u32 %s212_s11, 4  ;;  %p1618_p2 = pnand %p1281_p10, %p38_p3  ;;  %s1616_s12 = int_to_ptr.vmem [resolvable:$true] %s219_s12 }
  0x34   : > { %s1622_s14 = scalar_lea.sflag [#allocation5], %s208_s28  ;;  %s1376_s16 = scalar_lea.hbm %s1614_s10, 256 }
  0x35   : > { %p1377_p11 = scmp.ne.s32.totalorder %s1614_s10, %s1376_s16  ;;  %p1378_p7 = pneg %p1618_p2 }
  0x36   : > { %s1381_s29 = scalar_lea.hbm %s1735_s0, 512  ;;  %p1382_p13 = scmp.lt.s32.totalorder %s1614_s10, %s1735_s0 }
  0x37   : > { %p1379_p9 = pnand %p1378_p7, %p1377_p11  ;;  %p1383_p0 = scmp.lt.s32.totalorder %s1381_s29, %s1376_s16 }
  0x39   : > { %p1380_p12 = pneg %p1379_p9  ;;  %p1384_p10 = por %p1383_p0, %p1382_p13 }
  0x3b   : > { %p1385_p3 = pnand %p1384_p10, %p1380_p12 }
  0x3d   : > { %1388 = shalt.err (!%p1385_p3)
}
  0x3e   : > { %s1389_s28 = scalar_lea.vmem %s1616_s12, 256  ;;  %s1478_s11 = smov [#allocation4]  }
  0x3f   : > { %p1390_p1 = scmp.ne.s32.totalorder %s1616_s12, %s1389_s28  ;;  %s1394_s8 = sshll.u32 %s1478_s11, 4  ;;  %s1395_s8 = int_to_ptr.vmem [resolvable:$false] %s1394_s8 }
  0x40   : > { %s1396_s17 = scalar_lea.vmem %s1395_s8, 512  ;;  %p1397_p9 = scmp.lt.s32.totalorder %s1616_s12, %s1395_s8 }
  0x41   : > { %p1392_p6 = pnand %p1390_p1, %p1378_p7  ;;  %p1398_p5 = scmp.lt.s32.totalorder %s1396_s17, %s1389_s28 }
  0x43   : > { %p1393_p11 = pneg %p1392_p6  ;;  %p1399_p4 = por %p1398_p5, %p1397_p9 }
  0x45   : > { %p1400_p8 = pnand %p1399_p4, %p1393_p11 }
  0x47   : > { %1403 = shalt.err (!%p1400_p8)
}
  0x48   : > { %s1752_s16 = smov 128   ;;  %p1753_p1 = scmp.ne.s32.totalorder %s1748_s26, 0 }
  0x49   : > { %1274 = dma.hbm_to_vmem [thread:$0]  (!%p1618_p2), %s1614_s10, 256, %s1616_s12, %s1622_s14, %s1752_s16, %s1752_s16, %s1477_s9  }
  0x4a   : > { %231 = sbr.rel (%p1753_p1) target bundleno = 568 (0x238), region = 40  ;;  %s1649_s30 = sand.u32 (!%p1753_p1), 1, %s1464_s19  }
  0x4b   : > { %s987_s8 = sshll.u32 (!%p1753_p1), %s1649_s30, 4  ;;  %s234_s29 = scalar_lea.sflag (!%p1753_p1), [#allocation5], %s1649_s30 }
  0x4c   : > { %s1655_s13 = scalar_lea.vmem (!%p1753_p1), [#allocation4], %s987_s8  ;;  %p1754_p4 = scmp.ne.s32.totalorder (!%p1753_p1), %s1746_s24, 0 }
  0x4f   : > { %1447 = dma.done.wait (%p1754_p4), %s234_s29, 256  }
  0x50   : > { %1449 = vsyncadd (%p1754_p4), %s234_s29, 4294967040  ;;  %p1755_p6 = scmp.eq.s32.totalorder %s1534_s22, 0 }
  0x52   : > { %1451 = dma.done.wait (%p1755_p6), [#allocation8], 9216   ;;  %p1756_p8 = pmov %p1755_p6 }
  0x53   : > { %vm272_vm0 = vcmask 523264   ;;  %vm276_vm1 = vcmask 516096   ;;  %v1479_v0 = vmov 0.0   ;;  %v302_v1 = vld [vmem:[#allocation7 + $0x78] sm:$0xff]  ;;  %v301_v3 = vld [vmem:[#allocation7 + $0x70] sm:$0xff]  ;;  %v300_v5 = vld [vmem:[#allocation7 + $0x68] sm:$0xff] }
  0x54   : > { %1453 = vsyncadd (%p1756_p8), [#allocation8], 4294958080  ;;  %274 = vst.msk [vmem:[#allocation2 + $0x8] sm:$0xff] %vm272_vm0, %v1479_v0  ;;  %v291_v2 = vld [vmem:[#allocation7 + $0x38] sm:$0xff]  ;;  %1090 = vmatprep.subr.mxu0 %v302_v1  ;;  %v290_v4 = vld [vmem:[#allocation7 + $0x30] sm:$0xff]  ;;  %s271_s12 = scalar_lea.vmem [#allocation10], %s987_s8 }
  0x55   : > { %273 = vst.msk [vmem:[#allocation2] sm:$0xff] %vm272_vm0, %v1479_v0  ;;  %275 = vst.msk [vmem:[#allocation2 + $0x10] sm:$0xff] %vm272_vm0, %v1479_v0  ;;  %1109 = vmatprep.subr.mxu1 %v291_v2  ;;  %1091 = vmatpush3.msra.mxu0 %v302_v1  ;;  %v289_v6 = vld [vmem:[#allocation7 + $0x28] sm:$0xff]  ;;  %v299_v7 = vld [vmem:[#allocation7 + $0x60] sm:$0xff]  ;;  %s886_s14 = sshll.u32 %s271_s12, 4  ;;  %s1005_s6 = sshll.u32 %s1534_s22, 8  ;;  %s1687_s14 = int_to_ptr.vmem [resolvable:$true] %s886_s14 }
  0x56   : > { %570 = vst [vmem:[#allocation3] sm:$0xff] %v1479_v0  ;;  %573 = vst [vmem:[#allocation3 + $0x18] sm:$0x1] %v1479_v0  ;;  %1110 = vmatpush3.msra.mxu1 %v291_v2  ;;  %1092 = vmatprep.subr.mxu0 %v301_v3  ;;  %v288_v8 = vld [vmem:[#allocation7 + $0x20] sm:$0xff]  ;;  %v279_v10 = vld [vmem:[%s1655_s13 + $0x8] sm:$0xff]  ;;  %s1692_s11 = scalar_lea.hbm %s1740_s5, %s1005_s6  ;;  %s873_s17 = scalar_lea.sflag [#allocation6], %s1649_s30 }
  0x57   : > { %277 = vst.msk [vmem:[#allocation2 + $0x18] sm:$0x1] %vm276_vm1, %v1479_v0  ;;  %1111 = vmatprep.subr.mxu1 %v290_v4  ;;  %1093 = vmatpush3.msra.mxu0 %v301_v3  ;;  %v278_v9 = vld [vmem:[%s1655_s13] sm:$0xff]  ;;  %v298_v11 = vld [vmem:[#allocation7 + $0x58] sm:$0xff]  ;;  %v296_v15 = vld [vmem:[#allocation7 + $0x48] sm:$0xff]  ;;  %s1404_s16 = scalar_lea.vmem %s1687_s14, 256 }
  0x58   : > { %1112 = vmatpush3.msra.mxu1 %v290_v4  ;;  %1094 = vmatprep.subr.mxu0 %v300_v5  ;;  %v287_v12 = vld [vmem:[#allocation7 + $0x18] sm:$0xff]  ;;  %280 = vst.msk [vmem:[#allocation2 + $0x8] sm:$0xff] %vm272_vm0, %v278_v9  ;;  %281 = vst.msk [vmem:[#allocation2 + $0x10] sm:$0xff] %vm272_vm0, %v279_v10  ;;  %v297_v13 = vld [vmem:[#allocation7 + $0x50] sm:$0xff]  ;;  %p1405_p5 = scmp.ne.s32.totalorder %s1687_s14, %s1404_s16  ;;  %p1757_p2 = scmp.ne.s32.totalorder %s1750_s23, 0 }
  0x59   : > { %1113 = vmatprep.subr.mxu1 %v289_v6  ;;  %1095 = vmatpush3.msra.mxu0 %v300_v5  ;;  %v286_v14 = vld [vmem:[#allocation7 + $0x10] sm:$0xff]  ;;  %v285_v16 = vld [vmem:[#allocation7 + $0x8] sm:$0xff]  ;;  %v295_v17 = vld [vmem:[#allocation7 + $0x40] sm:$0xff]  ;;  %s1480_s22 = smov [#allocation10]  }
  0x5a   : > { %1114 = vmatpush3.msra.mxu1 %v289_v6  ;;  %1096 = vmatprep.subr.mxu0 %v299_v7  ;;  %v284_v18 = vld [vmem:[#allocation7] sm:$0xff]  ;;  %v475_v23 = vld [vmem:[#allocation7 + $0xb8] sm:$0xff]  ;;  %v474_v25 = vld [vmem:[#allocation7 + $0xb0] sm:$0xff]  ;;  %p1406_p7 = pnand %p1405_p5, %p1757_p2  ;;  %s1408_s8 = sshll.u32 %s1480_s22, 4  ;;  %s1409_s8 = int_to_ptr.vmem [resolvable:$false] %s1408_s8 }
  0x5b   : > { %1115 = vmatprep.subr.mxu1 %v288_v8  ;;  %1097 = vmatpush3.msra.mxu0 %v299_v7  ;;  %v473_v26 = vld [vmem:[#allocation7 + $0xa8] sm:$0xff]  ;;  %v472_v27 = vld [vmem:[#allocation7 + $0xa0] sm:$0xff]  ;;  %v471_v28 = vld [vmem:[#allocation7 + $0x98] sm:$0xff]  ;;  %s1410_s29 = scalar_lea.vmem %s1409_s8, 512  ;;  %p1411_p13 = scmp.lt.s32.totalorder %s1687_s14, %s1409_s8 }
  0x5c   : > { %1116 = vmatpush3.msra.mxu1 %v288_v8  ;;  %1098 = vmatprep.subr.mxu0 %v298_v11  ;;  %v470_v29 = vld [vmem:[#allocation7 + $0x90] sm:$0xff]  ;;  %v469_v30 = vld [vmem:[#allocation7 + $0x88] sm:$0xff]  ;;  %v468_v31 = vld [vmem:[#allocation7 + $0x80] sm:$0xff]  ;;  %p1407_p12 = pneg %p1406_p7  ;;  %p1412_p0 = scmp.lt.s32.totalorder %s1410_s29, %s1404_s16 }
  0x5d   : > { %1117 = vmatprep.subr.mxu1 %v287_v12  ;;  %1099 = vmatpush3.msra.mxu0 %v298_v11  ;;  %v612_v33 = vld [vmem:[#allocation9 + $0xf8] sm:$0xff]  ;;  %v611_v34 = vld [vmem:[#allocation9 + $0xf0] sm:$0xff]  ;;  %v610_v35 = vld [vmem:[#allocation9 + $0xe8] sm:$0xff] }
  0x5e   : > { %1118 = vmatpush3.msra.mxu1 %v287_v12  ;;  %1100 = vmatprep.subr.mxu0 %v297_v13  ;;  %v609_v36 = vld [vmem:[#allocation9 + $0xe0] sm:$0xff]  ;;  %v608_v37 = vld [vmem:[#allocation9 + $0xd8] sm:$0xff]  ;;  %v592_v39 = vld [vmem:[#allocation9 + $0x70] sm:$0xff]  ;;  %p1413_p10 = por %p1412_p0, %p1411_p13 }
  0x5f   : > { %1119 = vmatprep.subr.mxu1 %v286_v14  ;;  %1101 = vmatpush3.msra.mxu0 %v297_v13  ;;  %v292_v19 = vld [vmem:[#allocation2 + $0x8] sm:$0xff]  ;;  %v293_v21 = vld [vmem:[#allocation2 + $0x10] sm:$0xff]  ;;  %v593_v38 = vld [vmem:[#allocation9 + $0x78] sm:$0xff] }
  0x60   : > { %1120 = vmatpush3.msra.mxu1 %v286_v14  ;;  %1102 = vmatprep.subr.mxu0 %v296_v15  ;;  %v282_v20 = vld [vmem:[#allocation2 + $0x7] sm:$0xff]  ;;  %v283_v22 = vld [vmem:[#allocation2 + $0xf] sm:$0xff]  ;;  %v589_v45 = vld [vmem:[#allocation9 + $0x58] sm:$0xff]  ;;  %p1414_p3 = pnand %p1413_p10, %p1407_p12 }
  0x61   : > { %1121 = vmatprep.subr.mxu1 %v285_v16  ;;  %1103 = vmatpush3.msra.mxu0 %v296_v15  ;;  %v465_v24 = vld [vmem:[#allocation2 + $0x9] sm:$0xff]  ;;  %v466_v32 = vld [vmem:[#allocation2 + $0x11] sm:$0xff]  ;;  %v590_v43 = vld [vmem:[#allocation9 + $0x60] sm:$0xff] }
  0x62   : > { %1122 = vmatpush3.msra.mxu1 %v285_v16  ;;  %1104 = vmatprep.subr.mxu0 %v295_v17  ;;  %v591_v40 = vld [vmem:[#allocation9 + $0x68] sm:$0xff]  ;;  %v607_v41 = vld [vmem:[#allocation9 + $0xd0] sm:$0xff]  ;;  %v605_v44 = vld [vmem:[#allocation9 + $0xc0] sm:$0xff] }
  0x63   : > { %1123 = vmatprep.subr.mxu1 %v284_v18  ;;  %1105 = vmatpush3.msra.mxu0 %v295_v17  ;;  %v606_v42 = vld [vmem:[#allocation9 + $0xc8] sm:$0xff]  ;;  %v604_v46 = vld [vmem:[#allocation9 + $0xb8] sm:$0xff]  ;;  %v588_v47 = vld [vmem:[#allocation9 + $0x50] sm:$0xff] }
  0x64   : > { %1106 = vmatprep.mubr.msk.f32.mxu0 %vm272_vm0, %v292_v19  ;;  %1124 = vmatpush3.msra.mxu1 %v284_v18  ;;  %v603_v48 = vld [vmem:[#allocation9 + $0xb0] sm:$0xff]  ;;  %v587_v49 = vld [vmem:[#allocation9 + $0x48] sm:$0xff]  ;;  %v601_v51 = vld [vmem:[#allocation9 + $0xa0] sm:$0xff] }
  0x65   : > { %1125 = vmatprep.mubr.msk.f32.mxu1 %vm272_vm0, %v282_v20  ;;  %1107 = vmatmul.mubr.msk.f32.vlgmr.msra.gmra.mxu0 %vm272_vm0, %v293_v21  ;;  %v602_v50 = vld [vmem:[#allocation9 + $0xa8] sm:$0xff]  ;;  %v586_v52 = vld [vmem:[#allocation9 + $0x40] sm:$0xff]  ;;  %v600_v53 = vld [vmem:[#allocation9 + $0x98] sm:$0xff] }
  0x66   : > { %1126 = vmatmul.mubr.msk.f32.vlgmr.msra.gmra.mxu1 %vm272_vm0, %v283_v22  ;;  %1128 = vmatprep.subr.mxu0 %v475_v23  ;;  %v585_v54 = vld [vmem:[#allocation9 + $0x38] sm:$0xff]  ;;  %v599_v55 = vld [vmem:[#allocation9 + $0x90] sm:$0xff]  ;;  %v598_v57 = vld [vmem:[#allocation9 + $0x88] sm:$0xff] }
  0x67   : > { %1144 = vmatprep.mubr.msk.f32.mxu0 %vm272_vm0, %v465_v24  ;;  %1129 = vmatpush3.msra.mxu0 %v475_v23  ;;  %v584_v56 = vld [vmem:[#allocation9 + $0x30] sm:$0xff]  ;;  %v583_v58 = vld [vmem:[#allocation9 + $0x28] sm:$0xff]  ;;  %v597_v59 = vld [vmem:[#allocation9 + $0x80] sm:$0xff] }
  0x68   : > { %1130 = vmatprep.subr.mxu0 %v474_v25  ;;  %1147 = vmatprep.subr.mxu1 %v612_v33  ;;  %v582_v60 = vld [vmem:[#allocation9 + $0x20] sm:$0xff]  ;;  %v781_v61 = vld [vmem:[#allocation9 + $0x178] sm:$0xff]  ;;  %v580_v63 = vld [vmem:[#allocation9 + $0x10] sm:$0xff] }
  0x69   : > { %1131 = vmatpush3.msra.mxu0 %v474_v25  ;;  %1148 = vmatpush3.msra.mxu1 %v612_v33  ;;  %v581_v62 = vld [vmem:[#allocation9 + $0x18] sm:$0xff]  ;;  %v579_v0 = vld [vmem:[#allocation9 + $0x8] sm:$0xff]  ;;  %v578_v1 = vld [vmem:[#allocation9] sm:$0xff] }
  0x6a   : > { %1132 = vmatprep.subr.mxu0 %v473_v26  ;;  %1149 = vmatprep.subr.mxu1 %v611_v34  ;;  %v997_v8 = vld [vmem:[%s1737_s2] ss:$0 sm:$0xff]  ;;  %v780_v17 = vld [vmem:[#allocation9 + $0x170] sm:$0xff]  ;;  %v779_v18 = vld [vmem:[#allocation9 + $0x168] sm:$0xff] }
  0x6b   : > { %1133 = vmatpush3.msra.mxu0 %v473_v26  ;;  %1150 = vmatpush3.msra.mxu1 %v611_v34  ;;  %v778_v19 = vld [vmem:[#allocation9 + $0x160] sm:$0xff]  ;;  %v777_v20 = vld [vmem:[#allocation9 + $0x158] sm:$0xff]  ;;  %v776_v24 = vld [vmem:[#allocation9 + $0x150] sm:$0xff] }
  0x6c   : > { %1134 = vmatprep.subr.mxu0 %v472_v27  ;;  %1151 = vmatprep.subr.mxu1 %v610_v35  ;;  %v775_v25 = vld [vmem:[#allocation9 + $0x148] sm:$0xff]  ;;  %v774_v26 = vld [vmem:[#allocation9 + $0x140] sm:$0xff] }
  0x6d   : > { %1135 = vmatpush3.msra.mxu0 %v472_v27  ;;  %1152 = vmatpush3.msra.mxu1 %v610_v35  ;;  %v773_v27 = vld [vmem:[#allocation9 + $0x138] sm:$0xff]  ;;  %v767_v33 = vld [vmem:[#allocation9 + $0x108] sm:$0xff]  ;;  %v766_v34 = vld [vmem:[#allocation9 + $0x100] sm:$0xff] }
  0x6e   : > { %1136 = vmatprep.subr.mxu0 %v471_v28  ;;  %1153 = vmatprep.subr.mxu1 %v609_v36 }
  0x6f   : > { %1137 = vmatpush3.msra.mxu0 %v471_v28  ;;  %1154 = vmatpush3.msra.mxu1 %v609_v36  ;;  %v772_v28 = vld [vmem:[#allocation9 + $0x130] sm:$0xff] }
  0x70   : > { %1138 = vmatprep.subr.mxu0 %v470_v29  ;;  %1155 = vmatprep.subr.mxu1 %v608_v37 }
  0x71   : > { %1139 = vmatpush3.msra.mxu0 %v470_v29  ;;  %1156 = vmatpush3.msra.mxu1 %v608_v37  ;;  %v771_v29 = vld [vmem:[#allocation9 + $0x128] sm:$0xff] }
  0x72   : > { %1140 = vmatprep.subr.mxu0 %v469_v30  ;;  %1157 = vmatprep.subr.mxu1 %v607_v41 }
  0x73   : > { %1141 = vmatpush3.msra.mxu0 %v469_v30  ;;  %1158 = vmatpush3.msra.mxu1 %v607_v41  ;;  %v770_v30 = vld [vmem:[#allocation9 + $0x120] sm:$0xff] }
  0x74   : > { %1142 = vmatprep.subr.mxu0 %v468_v31  ;;  %1159 = vmatprep.subr.mxu1 %v606_v42 }
  0x75   : > { %1143 = vmatpush3.msra.mxu0 %v468_v31  ;;  %1160 = vmatpush3.msra.mxu1 %v606_v42  ;;  %v769_v31 = vld [vmem:[#allocation9 + $0x118] sm:$0xff]  ;;  %v998_v42 = vld [vmem:[%s1739_s4] ss:$0 sm:$0xff] }
  0x76   : > { %1145 = vmatmul.mubr.msk.f32.vlgmr.msra.gmra.mxu0 %vm272_vm0, %v466_v32  ;;  %1182 = vmatprep.subr.mxu0 %v593_v38  ;;  %v768_v32 = vld [vmem:[#allocation9 + $0x110] sm:$0xff] }
  0x77   : > { %1183 = vmatpush3.msra.mxu0 %v593_v38  ;;  %1161 = vmatprep.subr.mxu1 %v605_v44 }
  0x78   : > { %1184 = vmatprep.subr.mxu0 %v592_v39  ;;  %1162 = vmatpush3.msra.mxu1 %v605_v44 }
  0x79   : > { %1185 = vmatpush3.msra.mxu0 %v592_v39  ;;  %1163 = vmatprep.subr.mxu1 %v604_v46 }
  0x7a   : > { %1186 = vmatprep.subr.mxu0 %v591_v40  ;;  %1164 = vmatpush3.msra.mxu1 %v604_v46 }
  0x7b   : > { %1187 = vmatpush3.msra.mxu0 %v591_v40  ;;  %1165 = vmatprep.subr.mxu1 %v603_v48 }
  0x7c   : > { %1188 = vmatprep.subr.mxu0 %v590_v43  ;;  %1166 = vmatpush3.msra.mxu1 %v603_v48 }
  0x7d   : > { %1189 = vmatpush3.msra.mxu0 %v590_v43  ;;  %1167 = vmatprep.subr.mxu1 %v602_v50 }
  0x7e   : > { %1190 = vmatprep.subr.mxu0 %v589_v45  ;;  %1168 = vmatpush3.msra.mxu1 %v602_v50 }
  0x7f   : > { %1191 = vmatpush3.msra.mxu0 %v589_v45  ;;  %1169 = vmatprep.subr.mxu1 %v601_v51 }
  0x80   : > { %1192 = vmatprep.subr.mxu0 %v588_v47  ;;  %1170 = vmatpush3.msra.mxu1 %v601_v51 }
  0x81   : > { %1193 = vmatpush3.msra.mxu0 %v588_v47  ;;  %1171 = vmatprep.subr.mxu1 %v600_v53 }
  0x82   : > { %1194 = vmatprep.subr.mxu0 %v587_v49  ;;  %1172 = vmatpush3.msra.mxu1 %v600_v53 }
  0x83   : > { %1195 = vmatpush3.msra.mxu0 %v587_v49  ;;  %1173 = vmatprep.subr.mxu1 %v599_v55 }
  0x84   : > { %1196 = vmatprep.subr.mxu0 %v586_v52  ;;  %1174 = vmatpush3.msra.mxu1 %v599_v55 }
  0x85   : > { %1197 = vmatpush3.msra.mxu0 %v586_v52  ;;  %1175 = vmatprep.subr.mxu1 %v598_v57 }
  0x86   : > { %1198 = vmatprep.subr.mxu0 %v585_v54  ;;  %1176 = vmatpush3.msra.mxu1 %v598_v57 }
  0x87   : > { %1199 = vmatpush3.msra.mxu0 %v585_v54  ;;  %1177 = vmatprep.subr.mxu1 %v597_v59 }
  0x88   : > { %1200 = vmatprep.subr.mxu0 %v584_v56  ;;  %1178 = vmatpush3.msra.mxu1 %v597_v59 }
  0x89   : > { %1201 = vmatpush3.msra.mxu0 %v584_v56  ;;  %1217 = vmatprep.subr.mxu1 %v781_v61 }
  0x8a   : > { %1202 = vmatprep.subr.mxu0 %v583_v58 }
  0x8b   : > { %1203 = vmatpush3.msra.mxu0 %v583_v58 }
  0x8c   : > { %1204 = vmatprep.subr.mxu0 %v582_v60 }
  0x8d   : > { %1205 = vmatpush3.msra.mxu0 %v582_v60 }
  0x8e   : > { %1206 = vmatprep.subr.mxu0 %v581_v62 }
  0x8f   : > { %1207 = vmatpush3.msra.mxu0 %v581_v62 }
  0x90   : > { %1208 = vmatprep.subr.mxu0 %v580_v63 }
  0x91   : > { %1209 = vmatpush3.msra.mxu0 %v580_v63 }
  0x92   : > { %1210 = vmatprep.subr.mxu0 %v579_v0 }
  0x93   : > { %1211 = vmatpush3.msra.mxu0 %v579_v0 }
  0x94   : > { %1212 = vmatprep.subr.mxu0 %v578_v1 }
  0x95   : > { %1213 = vmatpush3.msra.mxu0 %v578_v1 }
 0x125   : > { %v1108_v2 = vpop.f32.mrf.mxu0 }
 0x126   : > { %v1127_v3 = vpop.f32.mrf.mxu1 }
 0x127   : > { %v375_v4 = vpop.f32.mrf.mxu0  ;;  %v462_v6 = vadd.f32 %v1127_v3, %v1108_v2 }
 0x128   : > { %v456_v5 = vpop.f32.mrf.mxu1 }
 0x129   : > { %v457_v9 = vadd.f32 %v456_v5, %v375_v4 }
 0x136   : > { %v1146_v7 = vpop.f32.mrf.mxu0 }
 0x137   : > { %v558_v10 = vadd.f32 %v1146_v7, %v462_v6 }
 0x138   : > { %v548_v11 = vpop.f32.mrf.mxu0 }
 0x139   : > { %v567_v12 = vadd.f32 %v997_v8, %v558_v10  ;;  %v557_v13 = vadd.f32 %v548_v11, %v457_v9 }
 0x13b   : > { %v569_v14 = vmax.f32 %v567_v12, 0.0  ;;  %v566_v15 = vadd.f32 %v997_v8, %v557_v13 }
 0x13d   : > { %575 = vst [vmem:[#allocation3 + $0x10] sm:$0xff] %v569_v14  ;;  %v568_v16 = vmax.f32 %v566_v15, 0.0 }
 0x13f   : > { %574 = vst [vmem:[#allocation3 + $0x8] sm:$0xff] %v568_v16  ;;  %1179 = vmatprep.mubr.f32.mxu1 %v568_v16 }
 0x140   : > { %1180 = vmatmul.mubr.f32.vlgmr.msra.gmra.mxu1 %v569_v14 }
 0x141   : > { %1218 = vmatpush3.msra.mxu1 %v781_v61 }
 0x142   : > { %1219 = vmatprep.subr.mxu1 %v780_v17 }
 0x143   : > { %1220 = vmatpush3.msra.mxu1 %v780_v17 }
 0x144   : > { %1221 = vmatprep.subr.mxu1 %v779_v18  ;;  %v764_v35 = vld [vmem:[#allocation3 + $0x11] sm:$0xff] }
 0x145   : > { %1222 = vmatpush3.msra.mxu1 %v779_v18 }
 0x146   : > { %v576_v21 = vld [vmem:[#allocation3 + $0x7] sm:$0xff]  ;;  %v577_v22 = vld [vmem:[#allocation3 + $0xf] sm:$0xff]  ;;  %1223 = vmatprep.subr.mxu1 %v778_v19 }
 0x147   : > { %v763_v23 = vld [vmem:[#allocation3 + $0x9] sm:$0xff]  ;;  %1214 = vmatprep.mubr.f32.mxu0 %v576_v21  ;;  %1224 = vmatpush3.msra.mxu1 %v778_v19 }
 0x148   : > { %1249 = vmatprep.mubr.f32.mxu1 %v763_v23  ;;  %1215 = vmatmul.mubr.f32.vlgmr.msra.gmra.mxu0 %v577_v22 }
 0x149   : > { %1225 = vmatprep.subr.mxu1 %v777_v20 }
 0x14a   : > { %1226 = vmatpush3.msra.mxu1 %v777_v20 }
 0x14b   : > { %1227 = vmatprep.subr.mxu1 %v776_v24 }
 0x14c   : > { %1228 = vmatpush3.msra.mxu1 %v776_v24 }
 0x14d   : > { %1229 = vmatprep.subr.mxu1 %v775_v25 }
 0x14e   : > { %1230 = vmatpush3.msra.mxu1 %v775_v25 }
 0x14f   : > { %1231 = vmatprep.subr.mxu1 %v774_v26 }
 0x150   : > { %1232 = vmatpush3.msra.mxu1 %v774_v26 }
 0x151   : > { %1233 = vmatprep.subr.mxu1 %v773_v27 }
 0x152   : > { %1234 = vmatpush3.msra.mxu1 %v773_v27 }
 0x153   : > { %1235 = vmatprep.subr.mxu1 %v772_v28 }
 0x154   : > { %1236 = vmatpush3.msra.mxu1 %v772_v28 }
 0x155   : > { %1237 = vmatprep.subr.mxu1 %v771_v29 }
 0x156   : > { %1238 = vmatpush3.msra.mxu1 %v771_v29 }
 0x157   : > { %1239 = vmatprep.subr.mxu1 %v770_v30 }
 0x158   : > { %1240 = vmatpush3.msra.mxu1 %v770_v30 }
 0x159   : > { %1241 = vmatprep.subr.mxu1 %v769_v31 }
 0x15a   : > { %1242 = vmatpush3.msra.mxu1 %v769_v31 }
 0x15b   : > { %1243 = vmatprep.subr.mxu1 %v768_v32 }
 0x15c   : > { %1244 = vmatpush3.msra.mxu1 %v768_v32 }
 0x15d   : > { %1245 = vmatprep.subr.mxu1 %v767_v33 }
 0x15e   : > { %1246 = vmatpush3.msra.mxu1 %v767_v33 }
 0x15f   : > { %1247 = vmatprep.subr.mxu1 %v766_v34 }
 0x160   : > { %1248 = vmatpush3.msra.mxu1 %v766_v34 }
 0x161   : > { %1250 = vmatmul.mubr.f32.vlgmr.msra.gmra.mxu1 %v764_v35 }
 0x200   : > { %v1181_v36 = vpop.f32.mrf.mxu1 }
 0x202   : > { %v679_v38 = vpop.f32.mrf.mxu1 }
 0x208   : > { %v1216_v37 = vpop.f32.mrf.mxu0 }
 0x209   : > { %v760_v40 = vadd.f32 %v1216_v37, %v1181_v36 }
 0x20a   : > { %v754_v39 = vpop.f32.mrf.mxu0 }
 0x20b   : > { %v755_v43 = vadd.f32 %v754_v39, %v679_v38 }
 0x221   : > { %v1251_v41 = vpop.f32.mrf.mxu1 }
 0x222   : > { %v858_v44 = vadd.f32 %v1251_v41, %v760_v40 }
 0x223   : > { %v848_v45 = vpop.f32.mrf.mxu1 }
 0x224   : > { %v867_v46 = vadd.f32 %v998_v42, %v858_v44  ;;  %v857_v47 = vadd.f32 %v848_v45, %v755_v43 }
 0x226   : > { %v869_v48 = vmax.f32 %v867_v46, 0.0  ;;  %v866_v49 = vadd.f32 %v998_v42, %v857_v47 }
 0x228   : > { %871 = vst [vmem:[%s271_s12 + $0x8] sm:$0xff] %v869_v48  ;;  %v868_v50 = vmax.f32 %v866_v49, 0.0 }
 0x22a   : > { %870 = vst [vmem:[%s271_s12] sm:$0xff] %v868_v50 }
 0x22b   : > { %1417 = shalt.err (!%p1414_p3)
}
 0x22c   : > { %s1418_s13 = scalar_lea.hbm %s1692_s11, 256  ;;  %s1422_s9 = scalar_lea.hbm %s1740_s5, 512 }
 0x22d   : > { %p1419_p11 = scmp.ne.s32.totalorder %s1692_s11, %s1418_s13  ;;  %p1423_p4 = scmp.lt.s32.totalorder %s1692_s11, %s1740_s5 }
 0x22e   : > { %p1424_p6 = scmp.lt.s32.totalorder %s1422_s9, %s1418_s13 }
 0x22f   : > { %p1420_p9 = pnand %p1419_p11, %p1757_p2 }
 0x230   : > { %p1425_p8 = por %p1424_p6, %p1423_p4 }
 0x231   : > { %p1421_p1 = pneg %p1420_p9 }
 0x233   : > { %p1426_p5 = pnand %p1425_p8, %p1421_p1 }
 0x235   : > { %1429 = shalt.err (!%p1426_p5)
}
 0x236   : > { %s1481_s6 = smov 128   ;;  %s1482_s7 = smov 8  }
 0x237   : > { %1262 = dma.vmem_to_hbm [thread:$0]  (%p1757_p2), %s1687_s14, 256, %s1692_s11, %s873_s17, %s1481_s6, %s1481_s6, %s1482_s7  }
 0x238 PF: > { %s901_s28 = sand.u32 1, %s1460_s18   ;;  %p1758_p7 = scmp.ne.s32.totalorder %s1747_s25, 0 }
 0x239   : > { %p1759_p12 = scmp.ge.s32.totalorder %s1472_s21, 2  ;;  %s902_s16 = scalar_lea.sflag [#allocation6], %s901_s28 }
 0x23b   : > { %p1276_p13 = pnand %p1759_p12, %p1758_p7 }
 0x23d   : > { %p1277_p0 = pneg %p1276_p13 }
 0x23f   : > { %1455 = dma.done.wait (%p1277_p0), %s902_s16, 256  }
 0x240   : > { %1457 = vsyncadd (%p1277_p0), %s902_s16, 4294967040  ;;  %p19_p10 = scmp.ge.s32.totalorder %s1591_s15, 4   ;;  %s1760_s18 = smov %s1464_s19 }
 0x241   : > { %s1761_s19 = smov %s1468_s20  ;;  %s1762_s20 = smov %s1607_s27 }
 0x242   : > { %s1763_s21 = smov %s1591_s15  ;;  %21 = sbr.rel (!%p19_p10) target bundleno = 6 (0x6), region = 97 }
 0x247   :  { %907 = vsyncpa [#allocation5], 1 }
 0x248   :  { %909 = vsyncpa [#allocation5 + $0x1], 1 }
 0x249   :  { %910 = vsyncpa [#allocation8], 1 }
 0x24a   :  { %911 = vsyncpa [#allocation6], 1 }
 0x24b   :  { %913 = vsyncpa [#allocation6 + $0x1], 1 }

</bundles_post_ra>
